<compile_context>
chip_gen: v7x
topology: tpu7x:2x2x1
jax: 0.10.0
libtpu: 0.0.40
codegen_flags: <defaults>
</compile_context>

<pallas_src>
import math

import jax
import jax.numpy as jnp
from jax.experimental import pallas as pl
from jax.experimental.pallas import tpu as pltpu


_VMEM_LIMIT = 64 * 1024 * 1024


# ----------------------------------------------------------------------------
# Linear kernel:  y = x @ w + b   (bf16 MXU feeds, f32 accumulate), tiled on M.
# Weights arrive already in bf16 from the wrapper; only the activation tile is
# cast inside the kernel.
# ----------------------------------------------------------------------------
def _linear_kernel(x_ref, w_ref, b_ref, o_ref):
    y = jnp.dot(
        x_ref[...].astype(jnp.bfloat16),   # activation cast per tile
        w_ref[...],                        # bf16 weight block (pre-cast in wrapper)
        preferred_element_type=jnp.float32,
    ) + b_ref[...]
    o_ref[...] = y.astype(o_ref.dtype)


def pallas_linear(x, w_bf16, b, tm: int = 512, out_dtype=None):
    # x: (M, K), w_bf16: (K, Nout) bf16, b: (Nout,)
    M, K = x.shape
    Nout = w_bf16.shape[1]
    out_dtype = x.dtype if out_dtype is None else out_dtype
    tm = min(tm, M)
    if tm != M:
        tm = max(8, (tm // 8) * 8)          # keep (8, 128) block constraint happy
    grid_m = pl.cdiv(M, tm)
    b2 = b.reshape(1, Nout).astype(jnp.float32)
    return pl.pallas_call(
        _linear_kernel,
        out_shape=jax.ShapeDtypeStruct((M, Nout), out_dtype),
        grid=(grid_m,),
        in_specs=[
            pl.BlockSpec((tm, K), lambda i: (i, 0)),
            pl.BlockSpec((K, Nout), lambda i: (0, 0)),     # constant block index
            pl.BlockSpec((1, Nout), lambda i: (0, 0)),
        ],
        out_specs=pl.BlockSpec((tm, Nout), lambda i: (i, 0)),
        compiler_params=pltpu.CompilerParams(
            dimension_semantics=("parallel",),
            vmem_limit_bytes=_VMEM_LIMIT),
    )(x, w_bf16, b2)


# ----------------------------------------------------------------------------
# Fused continuous-relative-position-bias MLP:
#   table_t = (relu(coords @ w1 + b1) @ w2 + b2)^T            -> shape (H, L)
# K=2 first projection done on the VPU (outer-product form); second matmul is
# computed directly in the transposed (H, L) layout, output in bf16 so the
# downstream gather materializes bf16 directly.
# ----------------------------------------------------------------------------
def _cpb_kernel(coords_ref, w1_ref, b1_ref, w2t_ref, b2_ref, o_ref):
    x = coords_ref[...].astype(jnp.float32)              # (L, 2)
    w1 = w1_ref[...]                                      # (2, 512) f32
    b1 = b1_ref[...]                                      # (1, 512) f32
    hidden = x[:, 0:1] * w1[0:1, :] + x[:, 1:2] * w1[1:2, :] + b1   # (L, 512), VPU
    hidden = jnp.maximum(hidden, 0.0)
    # (H, L) = w2^T @ hidden^T  (contract the 512 axis of both operands)
    tbl = jax.lax.dot_general(
        w2t_ref[...],                                     # (H, 512) bf16 (wrapper cast)
        hidden.astype(jnp.bfloat16),
        (((1,), (1,)), ((), ())),
        preferred_element_type=jnp.float32,
    )
    o_ref[...] = (tbl + b2_ref[...]).astype(o_ref.dtype)


def cpb_bias_table_t(coords, w1, b1, w2, b2):
    L = coords.shape[0]
    Kh = w1.shape[1]
    Hh = w2.shape[1]
    return pl.pallas_call(
        _cpb_kernel,
        out_shape=jax.ShapeDtypeStruct((Hh, L), jnp.bfloat16),
        grid=(1,),
        in_specs=[
            pl.BlockSpec((L, 2), lambda i: (0, 0)),
            pl.BlockSpec((2, Kh), lambda i: (0, 0)),
            pl.BlockSpec((1, Kh), lambda i: (0, 0)),
            pl.BlockSpec((Hh, Kh), lambda i: (0, 0)),
            pl.BlockSpec((Hh, 1), lambda i: (0, 0)),
        ],
        out_specs=pl.BlockSpec((Hh, L), lambda i: (0, 0)),
        compiler_params=pltpu.CompilerParams(vmem_limit_bytes=_VMEM_LIMIT),
    )(coords, w1, b1.reshape(1, Kh), w2.T.astype(jnp.bfloat16), b2.reshape(Hh, 1))


# ----------------------------------------------------------------------------
# Attention core kernel: one batch element per grid step, all heads in-block.
# Reads the untransposed (N, 3C) bf16 qkv slab via per-head ref slices and
# writes the (N, C) output with a single lane-dense store.
# Computes per head: softmax((l2n(q)*scale + qe*scale) @ l2n(k)^T + rel_bias) @ v
# ----------------------------------------------------------------------------
def attention_kernel(qkv_ref, sq_ref, bias_ref, o_ref):
    H = bias_ref.shape[0]
    C = o_ref.shape[2]
    D = C // H

    # TODO(synk): for production head counts (H>=8) move heads to a grid axis or
    # a fori_loop to bound vreg live ranges; fully unrolled is fine at H=4.
    outs = []
    for h in range(H):                                   # static unrolled head loop
        lo = h * D
        hi = lo + D
        # per-head ref slices (views) -> narrow loads; the full (N, 3C) slab is
        # never materialized as a value.
        q = qkv_ref[0, :, lo:hi].astype(jnp.float32)             # (N, D)
        k = qkv_ref[0, :, C + lo:C + hi].astype(jnp.float32)     # (N, D)
        v = qkv_ref[0, :, 2 * C + lo:2 * C + hi]                 # (N, D) bf16

        # F.normalize(dim=-1): x * rsqrt(max(sum(x^2), eps^2)), eps=1e-12
        qn = q * jax.lax.rsqrt(jnp.maximum(jnp.sum(q * q, axis=-1, keepdims=True), 1e-24))
        kn = k * jax.lax.rsqrt(jnp.maximum(jnp.sum(k * k, axis=-1, keepdims=True), 1e-24))

        # (qn + qe) * scale  ==  qn * scale + (qe * scale)   (folded in wrapper)
        qh = qn * sq_ref[0:1, lo:hi] + sq_ref[1:2, lo:hi]

        s = jax.lax.dot_general(                                 # (N, N), bf16 MXU feeds
            qh.astype(jnp.bfloat16), kn.astype(jnp.bfloat16),
            (((1,), (1,)), ((), ())),
            preferred_element_type=jnp.float32,
        )
        s = s + bias_ref[h]                                      # bf16 bias -> f32 add

        m = jnp.max(s, axis=-1, keepdims=True)
        e = jnp.exp(s - m)
        p = e * pl.reciprocal(jnp.sum(e, axis=-1, keepdims=True), approx=True)

        outs.append(jnp.dot(p.astype(jnp.bfloat16), v,
                            preferred_element_type=jnp.float32))  # (N, D) f32

    # single lane-dense (N, C) store instead of H masked sub-128-lane writes
    o_ref[0] = jnp.concatenate(outs, axis=-1).astype(o_ref.dtype)


def attention_core(qkv, scale_qe, rel_bias):
    # qkv: (B, N, 3C) bf16; scale_qe: (2, C) f32; rel_bias: (H, N, N) bf16
    B, N, C3 = qkv.shape
    C = C3 // 3
    H = rel_bias.shape[0]
    return pl.pallas_call(
        attention_kernel,
        out_shape=jax.ShapeDtypeStruct((B, N, C), jnp.bfloat16),
        grid=(B,),
        in_specs=[
            pl.BlockSpec((1, N, C3), lambda b: (b, 0, 0)),       # qkv, untransposed
            pl.BlockSpec((2, C), lambda b: (0, 0)),              # [scale ; qe*scale]
            pl.BlockSpec((H, N, N), lambda b: (0, 0, 0)),        # rel bias (bf16), const
        ],
        out_specs=pl.BlockSpec((1, N, C), lambda b: (b, 0, 0)),  # direct (B, N, C) layout
        compiler_params=pltpu.CompilerParams(
            dimension_semantics=("parallel",),
            vmem_limit_bytes=_VMEM_LIMIT),
    )(qkv, scale_qe, rel_bias)


# ----------------------------------------------------------------------------
# Full forward (glue in plain JAX, compute in Pallas)
# ----------------------------------------------------------------------------
def attention_forward(x, params, relative_pos_index, relative_coords_table, num_heads):
    B, N, C = x.shape
    H = num_heads
    D = C // H

    # bf16 weights prepared once in the wrapper.
    qkv_w = params["qkv_w"].astype(jnp.bfloat16)
    proj_w = params["proj_w"].astype(jnp.bfloat16)

    # qkv projection; bf16 output halves the HBM round-trip of the (B, N, 3C) temp.
    qkv = pallas_linear(x.reshape(B * N, C), qkv_w, params["qkv_b"],
                        out_dtype=jnp.bfloat16)
    qkv = qkv.reshape(B, N, 3 * C)

    # continuous relative position bias MLP (fused Pallas kernel, (H, L) bf16).
    # TODO(synk): data-dependent gather has no clean BlockSpec form; done in plain JAX.
    table_t = cpb_bias_table_t(relative_coords_table, params["cpb1_w"], params["cpb1_b"],
                               params["cpb2_w"], params["cpb2_b"])          # (H, L) bf16
    rel_bias = jnp.take(table_t, relative_pos_index.reshape(-1), axis=1)
    rel_bias = rel_bias.reshape(H, N, N)                                    # bf16

    # per-head scale = softplus(temperature) * seq_length_scale, folded per column
    scales = (jax.nn.softplus(params["temperature"]).reshape(H)
              * params["seq_length_scale"]).astype(jnp.float32)             # (H,)
    scale_row = jnp.repeat(scales, D).reshape(1, C)                          # (1, C)
    qe_scaled = params["query_embedding"].reshape(1, C) * scale_row          # (1, C)
    scale_qe = jnp.concatenate([scale_row, qe_scaled], axis=0)               # (2, C)

    out = attention_core(qkv, scale_qe, rel_bias)        # (B, N, C) bf16, no transpose

    # output projection (Pallas matmul); attn_drop / proj_drop are identity
    out = pallas_linear(out.reshape(B * N, C), proj_w, params["proj_b"],
                        out_dtype=x.dtype)
    return out.reshape(B, N, C)


# ----------------------------------------------------------------------------
# Pure-JAX reference for verification
# ----------------------------------------------------------------------------
def reference_forward(x, params, relative_pos_index, relative_coords_table, num_heads):
    B, N, C = x.shape
    H = num_heads
    D = C // H
    qkv = x @ params["qkv_w"] + params["qkv_b"]
    qkv = qkv.reshape(B, N, 3 * H, D).transpose(0, 2, 1, 3)
    q, k, v = qkv[:, :H], qkv[:, H:2 * H], qkv[:, 2 * H:]

    hidden = jax.nn.relu(relative_coords_table @ params["cpb1_w"] + params["cpb1_b"])
    bias_table = hidden @ params["cpb2_w"] + params["cpb2_b"]
    rel_bias = jnp.take(bias_table.T, relative_pos_index.reshape(-1), axis=1).reshape(H, N, N)

    def l2n(a):
        return a / jnp.maximum(jnp.sqrt(jnp.sum(a * a, axis=-1, keepdims=True)), 1e-12)

    scale = jax.nn.softplus(params["temperature"]).reshape(1, H, 1, 1) * params["seq_length_scale"]
    attn = (l2n(q) + params["query_embedding"][None]) * scale @ jnp.swapaxes(l2n(k), -2, -1)
    attn = attn + rel_bias[None]
    attn = jax.nn.softmax(attn, axis=-1)
    out = (attn @ v).transpose(0, 2, 1, 3).reshape(B, N, C)
    return out @ params["proj_w"] + params["proj_b"]


if __name__ == "__main__":
    # small config: dim=32, num_heads=4 (head_dim=8), input_resolution=(8,8) -> N=64
    B = 2
    C = 32
    num_heads = 4
    D = C // num_heads
    Hr, Wr = 8, 8
    N = Hr * Wr

    key = jax.random.PRNGKey(0)
    ks = jax.random.split(key, 8)

    params = {
        "qkv_w": (jax.random.normal(ks[0], (C, 3 * C), jnp.float32) * 0.02),
        "qkv_b": jnp.zeros((3 * C,), jnp.float32),
        "proj_w": (jax.random.normal(ks[1], (C, C), jnp.float32) * 0.02),
        "proj_b": jnp.zeros((C,), jnp.float32),
        "cpb1_w": (jax.random.normal(ks[2], (2, 512), jnp.float32) * 0.02),
        "cpb1_b": jnp.zeros((512,), jnp.float32),
        "cpb2_w": (jax.random.normal(ks[3], (512, num_heads), jnp.float32) * 0.02),
        "cpb2_b": jnp.zeros((num_heads,), jnp.float32),
        # temperature init = log(exp(1/0.24) - 1)  (so softplus(temperature) = 1/0.24)
        "temperature": jnp.full((num_heads, 1, 1),
                                math.log(math.exp(1.0 / 0.24) - 1.0), jnp.float32),
        # trunc_normal(std=0.02)
        "query_embedding": (jax.random.truncated_normal(
            ks[4], -2.0, 2.0, (num_heads, 1, D), jnp.float32) * 0.02),
        "seq_length_scale": jnp.log(jnp.asarray(float(Hr * Wr), jnp.float32)),
    }

    # relative position index (N, N) and relative coords table ((2H-1)*(2W-1), 2)
    coords = jnp.stack(jnp.meshgrid(jnp.arange(Hr), jnp.arange(Wr), indexing="ij"))
    coords_flat = coords.reshape(2, -1)                               # (2, N)
    rel = coords_flat[:, :, None] - coords_flat[:, None, :]           # (2, N, N)
    rel = rel.transpose(1, 2, 0) + jnp.array([Hr - 1, Wr - 1])
    relative_pos_index = (rel[..., 0] * (2 * Wr - 1) + rel[..., 1]).astype(jnp.int32)

    rh = jnp.arange(-(Hr - 1), Hr, dtype=jnp.float32) / (Hr - 1)
    rw = jnp.arange(-(Wr - 1), Wr, dtype=jnp.float32) / (Wr - 1)
    relative_coords_table = jnp.stack(
        jnp.meshgrid(rh, rw, indexing="ij"), axis=-1).reshape(-1, 2)  # (225, 2)

    x = jax.random.normal(ks[5], (B, N, C), jnp.float32)

    out = attention_forward(x, params, relative_pos_index, relative_coords_table, num_heads)
    out = jax.block_until_ready(out)

    ref = reference_forward(x, params, relative_pos_index, relative_coords_table, num_heads)
    assert out.shape == (B, N, C), out.shape
    assert bool(jnp.all(jnp.isfinite(out)))
    assert bool(jnp.allclose(out, ref, atol=1e-2, rtol=1e-2)), \
        float(jnp.max(jnp.abs(out - ref)))

    print("KERNEL_OK")
</pallas_src>

<mosaic_0001>
module attributes {stable_mosaic.version = 11 : i64} {
  func.func @_linear_kernel(%arg0: i32, %arg1: memref<128x32xf32, #tpu.memory_space<vmem>>, %arg2: memref<32x96xbf16, #tpu.memory_space<vmem>>, %arg3: memref<1x96xf32, #tpu.memory_space<vmem>>, %arg4: memref<128x96xbf16, #tpu.memory_space<vmem>>) attributes {dimension_semantics = [#tpu.dimension_semantics<parallel>], iteration_bounds = array<i64: 1>, scalar_prefetch = 0 : i64, scratch_operands = 0 : i64, tpu.core_type = #tpu.core_type<tc>, window_params = [{transform_indices = @transform_0, window_bounds = array<i64: 128, 32>}, {pipeline_mode = #tpu.pipeline_mode<synchronous>, transform_indices = @transform_1, window_bounds = array<i64: 32, 96>}, {pipeline_mode = #tpu.pipeline_mode<synchronous>, transform_indices = @transform_2, window_bounds = array<i64: 1, 96>}, {transform_indices = @transform_3, window_bounds = array<i64: 128, 96>}]} {
    %c0 = arith.constant 0 : index
    %c0_0 = arith.constant 0 : index
    %0 = vector.load %arg1[%c0, %c0_0] : memref<128x32xf32, #tpu.memory_space<vmem>>, vector<128x32xf32>
    %1 = arith.truncf %0 : vector<128x32xf32> to vector<128x32xbf16>
    %c0_1 = arith.constant 0 : index
    %c0_2 = arith.constant 0 : index
    %2 = vector.load %arg2[%c0_1, %c0_2] : memref<32x96xbf16, #tpu.memory_space<vmem>>, vector<32x96xbf16>
    %cst = arith.constant dense<0.000000e+00> : vector<128x96xf32>
    %3 = tpu.matmul %1, %2, %cst {dimension_numbers = #tpu.dot_dimension_numbers<[1], [0], [0], [1], [0, 0, 1, 1], [], []>} : vector<128x32xbf16>, vector<32x96xbf16>, vector<128x96xf32> -> vector<128x96xf32>
    %c0_3 = arith.constant 0 : index
    %c0_4 = arith.constant 0 : index
    %4 = vector.load %arg3[%c0_3, %c0_4] : memref<1x96xf32, #tpu.memory_space<vmem>>, vector<1x96xf32>
    %5 = vector.broadcast %4 : vector<1x96xf32> to vector<128x96xf32>
    %6 = arith.addf %3, %5 : vector<128x96xf32>
    %7 = arith.truncf %6 : vector<128x96xf32> to vector<128x96xbf16>
    %c0_5 = arith.constant 0 : index
    %c0_6 = arith.constant 0 : index
    %8 = vector.load %arg4[%c0_5, %c0_6] : memref<128x96xbf16, #tpu.memory_space<vmem>>, vector<128x96xbf16>
    tpu.vector_store %arg4[%c0_5, %c0_6], %7 {strides = array<i32>} : memref<128x96xbf16, #tpu.memory_space<vmem>>, vector<128x96xbf16>,
    return
  }
  func.func @transform_0(%arg0: i32) -> (i32, i32) {
    %c0_i32 = arith.constant 0 : i32
    %c0_i32_0 = arith.constant 0 : i32
    return %arg0, %c0_i32 : i32, i32
  }
  func.func @transform_1(%arg0: i32) -> (i32, i32) {
    %c0_i32 = arith.constant 0 : i32
    %c0_i32_0 = arith.constant 0 : i32
    %c0_i32_1 = arith.constant 0 : i32
    return %c0_i32, %c0_i32_0 : i32, i32
  }
  func.func @transform_2(%arg0: i32) -> (i32, i32) {
    %c0_i32 = arith.constant 0 : i32
    %c0_i32_0 = arith.constant 0 : i32
    %c0_i32_1 = arith.constant 0 : i32
    return %c0_i32, %c0_i32_0 : i32, i32
  }
  func.func @transform_3(%arg0: i32) -> (i32, i32) {
    %c0_i32 = arith.constant 0 : i32
    %c0_i32_0 = arith.constant 0 : i32
    return %arg0, %c0_i32 : i32, i32
  }
}

</mosaic_0001>

<bundles_post_ra>
// kernel: tpu_custom_call.1
= control target key start
LH: loop header
LB: loop body
LE: loop exit
PB: predicated region body
PF: predicated region fallthrough
CT: control target
= control target key end

     0   :  { %8 = vsyncpa [#allocation3], 0  ;;  %s610_s0 = inlined_call_operand.hbm [shape: f32[128,32], index: 0, kind: input, shape index: {}]   ;;  %s611_s1 = inlined_call_operand.hbm [shape: bf16[32,96], index: 1, kind: input, shape index: {}]   ;;  %s612_s2 = inlined_call_operand.hbm [shape: f32[1,96], index: 2, kind: input, shape index: {}]   ;;  %s613_s3 = inlined_call_operand.hbm [shape: bf16[128,96], index: 3, kind: output, shape index: {}]  }
   0x1   :  { %9 = vsyncpa [#allocation6], 0 }
   0x2   :  { %10 = vsyncpa [#allocation4], 0  ;;  %s504_s12 = smov [#allocation5]   ;;  %s410_s16 = scalar_lea.hbm %s611_s1, 256 }
   0x3   :  { %s28_s13 = sshll.u32 %s504_s12, 4  ;;  %p411_p0 = scmp.ne.s32.totalorder %s611_s1, %s410_s16  ;;  %s29_s13 = int_to_ptr.vmem [resolvable:$true] %s28_s13 }
   0x4   :  { %p414_p1 = scmp.lt.u32.totalorder %s410_s16, %s611_s1 }
   0x6   :  { %p416_p2 = pnand %p414_p1, %p411_p0 }
   0x8   :  { %419 = shalt.err (!%p416_p2)
}
   0x9   :  { %s420_s21 = scalar_lea.vmem %s29_s13, 256  ;;  %p425_p4 = scmp.lt.s32.totalorder %s29_s13, %s29_s13 }
   0xa   :  { %p421_p3 = scmp.ne.s32.totalorder %s29_s13, %s420_s21  ;;  %p426_p5 = scmp.lt.s32.totalorder %s420_s21, %s420_s21 }
   0xc   :  { %p427_p6 = por %p426_p5, %p425_p4 }
   0xe   :  { %p428_p7 = pnand %p427_p6, %p421_p3 }
  0x10   :  { %431 = shalt.err (!%p428_p7)
}
  0x11   :  { %s505_s22 = smov 64   ;;  %s506_s23 = smov 4  }
  0x12   :  { %34 = dma.hbm_to_vmem [thread:$0]  %s611_s1, 256, %s29_s13, [#allocation6], %s505_s22, %s505_s22, %s506_s23  }
  0x13   :  { %s507_s26 = smov [#allocation2]   ;;  %s432_s30 = scalar_lea.hbm %s610_s0, 2048 }
  0x14   :  { %s16_s27 = sshll.u32 %s507_s26, 4  ;;  %p433_p8 = scmp.ne.s32.totalorder %s610_s0, %s432_s30  ;;  %s17_s27 = int_to_ptr.vmem [resolvable:$true] %s16_s27 }
  0x15   :  { %p436_p9 = scmp.lt.u32.totalorder %s432_s30, %s610_s0 }
  0x17   :  { %p438_p10 = pnand %p436_p9, %p433_p8 }
  0x19   :  { %441 = shalt.err (!%p438_p10)
}
  0x1a   :  { %s442_s8 = scalar_lea.vmem %s17_s27, 2048  ;;  %p447_p12 = scmp.lt.s32.totalorder %s17_s27, %s17_s27 }
  0x1b   :  { %p443_p11 = scmp.ne.s32.totalorder %s17_s27, %s442_s8  ;;  %p448_p13 = scmp.lt.s32.totalorder %s442_s8, %s442_s8 }
  0x1d   :  { %p449_p0 = por %p448_p13, %p447_p12 }
  0x1f   :  { %p450_p1 = pnand %p449_p0, %p443_p11 }
  0x21   :  { %453 = shalt.err (!%p450_p1)
}
  0x22   :  { %s508_s1 = smov 128   ;;  %s509_s9 = smov 8  }
  0x23   :  { %22 = dma.hbm_to_vmem [thread:$0]  %s610_s0, 2048, %s17_s27, [#allocation3], %s508_s1, %s508_s1, %s509_s9  }
  0x24   :  { %s510_s12 = smov [#allocation7]   ;;  %s454_s16 = scalar_lea.hbm %s612_s2, 16 }
  0x25   :  { %s41_s13 = sshll.u32 %s510_s12, 4  ;;  %p455_p2 = scmp.ne.s32.totalorder %s612_s2, %s454_s16  ;;  %s42_s13 = int_to_ptr.vmem [resolvable:$true] %s41_s13 }
  0x26   :  { %p458_p3 = scmp.lt.u32.totalorder %s454_s16, %s612_s2 }
  0x28   :  { %p460_p4 = pnand %p458_p3, %p455_p2 }
  0x2a   :  { %463 = shalt.err (!%p460_p4)
}
  0x2b   :  { %s464_s21 = scalar_lea.vmem %s42_s13, 16  ;;  %s468_s0 = scalar_lea.vmem %s42_s13, 32 }
  0x2c   :  { %p465_p5 = scmp.ne.s32.totalorder %s42_s13, %s464_s21  ;;  %p469_p6 = scmp.lt.s32.totalorder %s42_s13, %s42_s13 }
  0x2d   :  { %p470_p7 = scmp.lt.s32.totalorder %s468_s0, %s464_s21 }
  0x2f   :  { %p471_p8 = por %p470_p7, %p469_p6 }
  0x31   :  { %p472_p9 = pnand %p471_p8, %p465_p5 }
  0x33   :  { %475 = shalt.err (!%p472_p9)
}
  0x34   :  { %44 = dma.hbm_to_vmem [thread:$0]  %s612_s2, 16, %s42_s13, [#allocation6]  }
  0x35   :  { %498 = dma.done.wait [#allocation3], 2048  }
  0x36   :  { %499 = vsyncadd [#allocation3], 4294965248 }
  0x37   :  { %500 = dma.done.wait [#allocation6], 272  }
  0x38   :  { %501 = vsyncadd [#allocation6], 4294967024  ;;  %v408_v0 = vld [vmem:[#allocation5] sm:$0xff]   ;;  %v409_v1 = vld [vmem:[#allocation5 + $0x8] sm:$0xff]   ;;  %vm102_vm0 = vcmask 261120   ;;  %vm288_vm1 = vcmask 781312  }
  0x39   :  { %376 = vmatprep.subr.bf16.mxu0 %v408_v0  ;;  %396 = vmatprep.subr.bf16.mxu1 %v408_v0  ;;  %v55_v2 = vld [vmem:[#allocation2] sm:$0xff]  ;;  %v56_v3 = vld [vmem:[#allocation2 + $0x8] sm:$0xff]  ;;  %v57_v7 = vld [vmem:[#allocation2 + $0x10] sm:$0xff]  ;;  %s511_s2 = smov [#allocation8]  }
  0x3a   :  { %v63_v4 = vld [vmem:[#allocation2 + $0x40] sm:$0xff]  ;;  %377 = vmatpush3.bf16.msra.mxu0 %v408_v0  ;;  %398 = vmatpush3.bf16.msra.mxu1 %v408_v0  ;;  %v71_v5 = vpack.c.bf16 %v56_v3, %v55_v2  ;;  %v64_v6 = vld [vmem:[#allocation2 + $0x48] sm:$0xff]  ;;  %v58_v8 = vld [vmem:[#allocation2 + $0x18] sm:$0xff]  ;;  %s310_s26 = sshll.u32 %s511_s2, 4  ;;  %s311_s26 = int_to_ptr.vmem [resolvable:$true] %s310_s26 }
  0x3b   :  { %378 = vmatprep.subr.bf16.mxu0 %v409_v1  ;;  %397 = vmatprep.subr.bf16.mxu1 %v409_v1  ;;  %v75_v9 = vpack.c.bf16 %v64_v6, %v63_v4  ;;  %v65_v10 = vld [vmem:[#allocation2 + $0x50] sm:$0xff]  ;;  %v66_v11 = vld [vmem:[#allocation2 + $0x58] sm:$0xff]  ;;  %v59_v12 = vld [vmem:[#allocation2 + $0x20] sm:$0xff]  ;;  %v72_v16 = vpack.c.bf16 %v58_v8, %v57_v7  ;;  %s476_s27 = scalar_lea.vmem %s311_s26, 1024  ;;  %p481_p11 = scmp.lt.s32.totalorder %s311_s26, %s311_s26 }
  0x3c   :  { %380 = vmatprep.mubr.msk.bf16.mxu0 %vm102_vm0, %v71_v5  ;;  %v60_v13 = vld [vmem:[#allocation2 + $0x28] sm:$0xff]  ;;  %v67_v14 = vld [vmem:[#allocation2 + $0x60] sm:$0xff]  ;;  %v76_v17 = vpack.c.bf16 %v66_v11, %v65_v10  ;;  %v61_v20 = vld [vmem:[#allocation2 + $0x30] sm:$0xff]  ;;  %p477_p10 = scmp.ne.s32.totalorder %s311_s26, %s476_s27  ;;  %p482_p12 = scmp.lt.s32.totalorder %s476_s27, %s476_s27 }
  0x3d   :  { %v68_v15 = vld [vmem:[#allocation2 + $0x68] sm:$0xff]  ;;  %388 = vmatprep.mubr.msk.bf16.mxu1 %vm102_vm0, %v75_v9  ;;  %v73_v18 = vpack.c.bf16 %v60_v13, %v59_v12  ;;  %v62_v21 = vld [vmem:[#allocation2 + $0x38] sm:$0xff]  ;;  %v69_v22 = vld [vmem:[#allocation2 + $0x70] sm:$0xff] }
  0x3e   :  { %379 = vmatpush3.bf16.msra.mxu0 %v409_v1  ;;  %399 = vmatpush3.bf16.msra.mxu1 %v409_v1  ;;  %v77_v19 = vpack.c.bf16 %v68_v15, %v67_v14  ;;  %v70_v23 = vld [vmem:[#allocation2 + $0x78] sm:$0xff]  ;;  %v74_v24 = vpack.c.bf16 %v62_v21, %v61_v20  ;;  %v323_v26 = vld [vmem:[#allocation7] ss:$0 sm:$0xff]  ;;  %p483_p13 = por %p482_p12, %p481_p11 }
  0x3f   :  { %v78_v25 = vpack.c.bf16 %v70_v23, %v69_v22 }
  0x40   :  { %p484_p0 = pnand %p483_p13, %p477_p10 }
  0x41   :  { %381 = vmatmul.mubr.msk.bf16.vlgmr.msra.gmra.mrb[0].mxu0 %vm102_vm0, %v72_v16  ;;  %389 = vmatmul.mubr.msk.bf16.vlgmr.msra.gmra.mrb[0].mxu1 %vm102_vm0, %v76_v17 }
  0x42   :  { %384 = vmatprep.mubr.msk.bf16.mxu0 %vm102_vm0, %v73_v18  ;;  %392 = vmatprep.mubr.msk.bf16.mxu1 %vm102_vm0, %v77_v19 }
  0x49   :  { %385 = vmatmul.mubr.msk.bf16.gmra.mrb[4].mxu0 %vm102_vm0, %v74_v24  ;;  %393 = vmatmul.mubr.msk.bf16.gmra.mrb[4].mxu1 %vm102_vm0, %v78_v25 }
 0x114   :  { %v382_v27 = vpop.f32.mrb[0].mxu0  ;;  %v390_v28 = vpop.f32.mrb[0].mxu1 }
 0x115   :  { %v170_v29 = vadd.f32 %v382_v27, %v323_v26  ;;  %v202_v30 = vadd.f32 %v390_v28, %v323_v26  ;;  %v161_v31 = vpop.f32.mrb[1].mxu0  ;;  %v193_v32 = vpop.f32.mrb[1].mxu1 }
 0x116   :  { %v162_v33 = vadd.f32 %v323_v26, %v161_v31  ;;  %v194_v34 = vadd.f32 %v323_v26, %v193_v32  ;;  %v383_v35 = vpop.f32.mrb[2].mxu0  ;;  %v391_v36 = vpop.f32.mrb[2].mxu1 }
 0x117   :  { %v352_v37 = vpack.c.bf16 %v170_v29, %v170_v29  ;;  %v360_v38 = vpack.c.bf16 %v202_v30, %v202_v30  ;;  %v173_v39 = vadd.f32 %v383_v35, %v323_v26  ;;  %v205_v40 = vadd.f32 %v391_v36, %v323_v26  ;;  %v164_v41 = vpop.f32.mrb[3].mxu0  ;;  %v196_v42 = vpop.f32.mrb[3].mxu1 }
 0x118   :  { %v350_v43 = vpack.c.bf16 %v162_v33, %v162_v33  ;;  %v358_v44 = vpack.c.bf16 %v194_v34, %v194_v34  ;;  %v165_v45 = vadd.f32 %v323_v26, %v164_v41  ;;  %v197_v46 = vadd.f32 %v323_v26, %v196_v42 }
 0x119   :  { %291 = vst.msk [vmem:[#allocation8 + $0x8] sm:$0xf] %vm288_vm1, %v352_v37  ;;  %299 = vst.msk [vmem:[#allocation8 + $0x28] sm:$0xf] %vm288_vm1, %v360_v38  ;;  %v353_v47 = vpack.c.bf16 %v173_v39, %v173_v39  ;;  %v361_v48 = vpack.c.bf16 %v205_v40, %v205_v40 }
 0x11a   :  { %289 = vst.msk [vmem:[#allocation8] sm:$0xf] %vm288_vm1, %v350_v43  ;;  %297 = vst.msk [vmem:[#allocation8 + $0x20] sm:$0xf] %vm288_vm1, %v358_v44  ;;  %v351_v49 = vpack.c.bf16 %v165_v45, %v165_v45  ;;  %v359_v50 = vpack.c.bf16 %v197_v46, %v197_v46 }
 0x11b   :  { %292 = vst.msk [vmem:[#allocation8 + $0xc] sm:$0xf] %vm288_vm1, %v353_v47  ;;  %300 = vst.msk [vmem:[#allocation8 + $0x2c] sm:$0xf] %vm288_vm1, %v361_v48 }
 0x11c   :  { %290 = vst.msk [vmem:[#allocation8 + $0x4] sm:$0xf] %vm288_vm1, %v351_v49  ;;  %298 = vst.msk [vmem:[#allocation8 + $0x24] sm:$0xf] %vm288_vm1, %v359_v50  ;;  %v386_v51 = vpop.f32.mrb[4].mxu0  ;;  %v394_v52 = vpop.f32.mrb[4].mxu1 }
 0x11d   :  { %v186_v53 = vadd.f32 %v386_v51, %v323_v26  ;;  %v218_v54 = vadd.f32 %v394_v52, %v323_v26  ;;  %v177_v55 = vpop.f32.mrb[5].mxu0  ;;  %v209_v56 = vpop.f32.mrb[5].mxu1 }
 0x11e   :  { %v178_v57 = vadd.f32 %v323_v26, %v177_v55  ;;  %v210_v58 = vadd.f32 %v323_v26, %v209_v56  ;;  %v387_v59 = vpop.f32.mrb[6].mxu0  ;;  %v395_v60 = vpop.f32.mrb[6].mxu1 }
 0x11f   :  { %v356_v61 = vpack.c.bf16 %v186_v53, %v186_v53  ;;  %v364_v62 = vpack.c.bf16 %v218_v54, %v218_v54  ;;  %v189_v63 = vadd.f32 %v387_v59, %v323_v26  ;;  %v221_v0 = vadd.f32 %v395_v60, %v323_v26  ;;  %v180_v1 = vpop.f32.mrb[7].mxu0  ;;  %v212_v2 = vpop.f32.mrb[7].mxu1 }
 0x120   :  { %v354_v3 = vpack.c.bf16 %v178_v57, %v178_v57  ;;  %v362_v4 = vpack.c.bf16 %v210_v58, %v210_v58  ;;  %v181_v5 = vadd.f32 %v323_v26, %v180_v1  ;;  %v213_v6 = vadd.f32 %v323_v26, %v212_v2 }
 0x121   :  { %295 = vst.msk [vmem:[#allocation8 + $0x18] sm:$0xf] %vm288_vm1, %v356_v61  ;;  %303 = vst.msk [vmem:[#allocation8 + $0x38] sm:$0xf] %vm288_vm1, %v364_v62  ;;  %v357_v7 = vpack.c.bf16 %v189_v63, %v189_v63  ;;  %v365_v8 = vpack.c.bf16 %v221_v0, %v221_v0 }
 0x122   :  { %293 = vst.msk [vmem:[#allocation8 + $0x10] sm:$0xf] %vm288_vm1, %v354_v3  ;;  %301 = vst.msk [vmem:[#allocation8 + $0x30] sm:$0xf] %vm288_vm1, %v362_v4  ;;  %v355_v9 = vpack.c.bf16 %v181_v5, %v181_v5  ;;  %v363_v10 = vpack.c.bf16 %v213_v6, %v213_v6 }
 0x123   :  { %296 = vst.msk [vmem:[#allocation8 + $0x1c] sm:$0xf] %vm288_vm1, %v357_v7  ;;  %304 = vst.msk [vmem:[#allocation8 + $0x3c] sm:$0xf] %vm288_vm1, %v365_v8 }
 0x124   :  { %294 = vst.msk [vmem:[#allocation8 + $0x14] sm:$0xf] %vm288_vm1, %v355_v9  ;;  %302 = vst.msk [vmem:[#allocation8 + $0x34] sm:$0xf] %vm288_vm1, %v363_v10 }
 0x125   :  { %487 = shalt.err (!%p484_p0)
}
 0x126   :  { %s488_s30 = scalar_lea.hbm %s613_s3, 1024 }
 0x127   :  { %p489_p1 = scmp.ne.s32.totalorder %s613_s3, %s488_s30  ;;  %p492_p2 = scmp.lt.u32.totalorder %s488_s30, %s613_s3 }
 0x129   :  { %p494_p3 = pnand %p492_p2, %p489_p1 }
 0x12b   :  { %497 = shalt.err (!%p494_p3)
}
 0x12c   :  { %316 = dma.vmem_to_hbm [thread:$0]  %s311_s26, 1024, %s613_s3, [#allocation4], %s505_s22, %s505_s22, %s506_s23  }
 0x12d   :  { %502 = dma.done.wait [#allocation4], 1024  }
 0x12e   :  { %503 = vsyncadd [#allocation4], 4294966272 }
 0x12f   :  { %320 = vsyncpa [#allocation3], 1 }
 0x130   :  { %321 = vsyncpa [#allocation6], 1 }
 0x131   :  { %322 = vsyncpa [#allocation4], 1 }

</bundles_post_ra>
